<compile_context>
chip_gen: v7x
topology: tpu7x:2x2x1
jax: 0.10.0
libtpu: 0.0.40
codegen_flags: <defaults>
</compile_context>

<pallas_src>
import jax
import jax.numpy as jnp
from jax.experimental import pallas as pl
from jax.experimental.pallas import tpu as pltpu


def _round_up(x: int, m: int) -> int:
    return (x + m - 1) // m * m


def _make_kernel(n_delta_sets: int):
    use_select = n_delta_sets <= 8

    def kernel(x_ref, didx_ref, deltas_ref, o_ref):
        # x_ref:      (tb, D)   rows of in_repr (VMEM)
        # didx_ref:   (tb, 1)   int32 precomposed delta-set index per row
        # deltas_ref: (nds, D)  full delta table, resident in VMEM
        # o_ref:      (tb, D)
        x = x_ref[...].astype(jnp.float32)
        didx = didx_ref[...]                               # (tb, 1) int32
        if use_select:
            # Unrolled VPU select-accumulate: no one-hot tile, no MXU.
            acc = x
            for s in range(n_delta_sets):
                row = deltas_ref[s, :].astype(jnp.float32)         # (D,)
                acc = acc + jnp.where(didx == s, row[None, :], 0.0)
        else:
            # One-hot gather on the MXU for larger tables.
            # TODO(synk): if n_delta_sets grows into the hundreds, tile the
            #             delta table along nds instead of keeping it resident.
            tb = x_ref.shape[0]
            ids = jax.lax.broadcasted_iota(jnp.int32, (tb, n_delta_sets), 1)
            one_hot = (ids == didx).astype(jnp.float32)
            acc = x + jnp.dot(one_hot, deltas_ref[...].astype(jnp.float32),
                              preferred_element_type=jnp.float32)
        o_ref[...] = acc.astype(o_ref.dtype)

    return kernel


def modular_weights_forward(in_repr, deltas, user_idxs, user_to_delta_set,
                            *, target_tile_bytes=2 * 1024 * 1024):
    """in_repr: [B, D], deltas: [n_delta_sets, D],
    user_idxs: [B] int, user_to_delta_set: [n_users] int  ->  [B, D]."""
    B, D = in_repr.shape
    nds = deltas.shape[0]
    x_item = jnp.dtype(in_repr.dtype).itemsize
    d_item = jnp.dtype(deltas.dtype).itemsize

    # Precompose the double gather user->delta_set (trivial scalar int gather).
    # TODO(synk): out-of-range indices silently select no delta here instead of
    #             failing like the PyTorch-side constructor assert.
    d_idx = user_to_delta_set.astype(jnp.int32)[user_idxs.astype(jnp.int32)]
    d_idx_col = d_idx.reshape(B, 1)

    # --- generation-aware VMEM budget (v5e/v6e 128 MiB phys, v7x 64 MiB) ---
    try:
        vmem_phys = int(pltpu.get_tpu_info().vmem_capacity_bytes)
    except Exception:
        vmem_phys = 64 * 1024 * 1024
    vmem_budget = min(vmem_phys // 2, 64 * 1024 * 1024)

    # VMEM footprint estimates (lane/sublane padded).
    row_bytes = _round_up(D, 128) * x_item          # one x / out row in VMEM
    didx_row_bytes = 512                            # (tb, 1) i32 -> 1/8 vreg per row
    deltas_bytes = _round_up(nds, 8) * _round_up(D, 128) * d_item

    # Delta table: block index never changes -> single-buffer it when the
    # second buffer would actually cost meaningful VMEM.
    deltas_bufs = 2
    deltas_spec = pl.BlockSpec((nds, D), lambda i: (0, 0))
    if deltas_bytes > (1 << 20):
        try:
            deltas_spec = pl.BlockSpec((nds, D), lambda i: (0, 0),
                                       pipeline_mode=pl.Buffered(1))
            deltas_bufs = 1
        except (TypeError, ValueError):
            pass

    # Largest tile that fits the budget, clamped to the ~2 MiB/tile sweet spot
    # and to the batch.
    per_row = 2 * row_bytes + 2 * row_bytes + 2 * didx_row_bytes
    avail = vmem_budget - deltas_bufs * deltas_bytes - (2 << 20)   # headroom
    tb_budget = max(8, (max(avail, 8 * per_row) // per_row) // 8 * 8)
    tb_target = max(8, (target_tile_bytes // max(row_bytes, 1)) // 8 * 8)
    tb = min(tb_budget, tb_target)
    if B <= 8:
        tb = B                      # full-dim block (legal even if B % 8 != 0)
    else:
        tb = min(tb, (B // 8) * 8)

    grid = (pl.cdiv(B, tb),)        # partial last block handled by Pallas

    cost = pl.CostEstimate(
        flops=2 * B * D * (min(nds, 8) + 1),
        transcendentals=0,
        bytes_accessed=2 * B * D * x_item + B * 4 + nds * D * d_item,
    )

    kernel = _make_kernel(nds)
    out = pl.pallas_call(
        kernel,
        out_shape=jax.ShapeDtypeStruct((B, D), in_repr.dtype),
        grid_spec=pltpu.PrefetchScalarGridSpec(
            num_scalar_prefetch=0,
            grid=grid,
            in_specs=[
                pl.BlockSpec((tb, D), lambda i: (i, 0)),   # in_repr tile i
                pl.BlockSpec((tb, 1), lambda i: (i, 0)),   # per-row delta idx
                deltas_spec,                               # resident delta table
            ],
            out_specs=pl.BlockSpec((tb, D), lambda i: (i, 0)),
        ),
        compiler_params=pltpu.CompilerParams(
            # TODO(synk): on v7x, confirm via trace that both TensorCores pick
            #             up this axis; if not, switch to pltpu.CORE_PARALLEL.
            dimension_semantics=("parallel",),
            vmem_limit_bytes=int(vmem_budget),
        ),
        cost_estimate=cost,
    )(in_repr, d_idx_col, deltas)
    return out


if __name__ == "__main__":
    key = jax.random.PRNGKey(0)
    batch, latent_dim = 8, 128
    n_users, n_delta_sets = 16, 3

    k_x, k_u, k_d = jax.random.split(key, 3)

    # inputs to forward(in_repr, user_idxs)
    in_repr = jax.random.normal(k_x, (batch, latent_dim), dtype=jnp.float32)
    user_idxs = jax.random.randint(k_u, (batch,), 0, n_users, dtype=jnp.int32)

    # module "constructor" state (deterministic):
    #   user_to_delta_set covers [0, n_delta_sets-1] as required by the assert
    user_to_delta_set = jnp.arange(n_users, dtype=jnp.int32) % n_delta_sets
    #   learnable Δs, one row per delta set
    deltas = 0.01 * jax.random.normal(
        k_d, (n_delta_sets, latent_dim), dtype=jnp.float32)

    out = modular_weights_forward(in_repr, deltas, user_idxs, user_to_delta_set)
    out = jax.block_until_ready(out)

    # pure-JAX reference check
    ref = in_repr + deltas[user_to_delta_set[user_idxs]]
    assert out.shape == (batch, latent_dim)
    assert jnp.allclose(out, ref, atol=1e-6), "Pallas output mismatch vs reference"

    print("KERNEL_OK")
</pallas_src>

<mosaic_0001>
module attributes {stable_mosaic.version = 11 : i64} {
  func.func @kernel(%arg0: i32, %arg1: memref<8x128xf32, #tpu.memory_space<vmem>>, %arg2: memref<8x1xi32, #tpu.memory_space<vmem>>, %arg3: memref<3x128xf32, #tpu.memory_space<vmem>>, %arg4: memref<8x128xf32, #tpu.memory_space<vmem>>) attributes {dimension_semantics = [#tpu.dimension_semantics<parallel>], iteration_bounds = array<i64: 1>, scalar_prefetch = 0 : i64, scratch_operands = 0 : i64, tpu.core_type = #tpu.core_type<tc>, window_params = [{transform_indices = @transform_0, window_bounds = array<i64: 8, 128>}, {transform_indices = @transform_1, window_bounds = array<i64: 8, 1>}, {pipeline_mode = #tpu.pipeline_mode<synchronous>, transform_indices = @transform_2, window_bounds = array<i64: 3, 128>}, {transform_indices = @transform_3, window_bounds = array<i64: 8, 128>}]} {
    %c0 = arith.constant 0 : index
    %c0_0 = arith.constant 0 : index
    %0 = vector.load %arg1[%c0, %c0_0] : memref<8x128xf32, #tpu.memory_space<vmem>>, vector<8x128xf32>
    %c0_1 = arith.constant 0 : index
    %c0_2 = arith.constant 0 : index
    %1 = vector.load %arg2[%c0_1, %c0_2] : memref<8x1xi32, #tpu.memory_space<vmem>>, vector<8x1xi32>
    %c0_3 = arith.constant 0 : index
    %c0_4 = arith.constant 0 : index
    %2 = vector.load %arg3[%c0_3, %c0_4] : memref<3x128xf32, #tpu.memory_space<vmem>>, vector<1x128xf32>
    %3 = vector.shape_cast %2 : vector<1x128xf32> to vector<128xf32>
    %c0_i32 = arith.constant 0 : i32
    %4 = vector.broadcast %c0_i32 : i32 to vector<8x1xi32>
    %5 = arith.cmpi eq, %1, %4 : vector<8x1xi32>
    %6 = vector.shape_cast %3 : vector<128xf32> to vector<1x128xf32>
    %cst = arith.constant 0.000000e+00 : f32
    %7 = vector.shape_cast %5 : vector<8x1xi1> to vector<8x1xi1>
    %8 = vector.broadcast %7 : vector<8x1xi1> to vector<8x128xi1>
    %9 = vector.shape_cast %6 : vector<1x128xf32> to vector<1x128xf32>
    %10 = vector.broadcast %9 : vector<1x128xf32> to vector<8x128xf32>
    %11 = vector.broadcast %cst : f32 to vector<8x128xf32>
    %12 = arith.select %8, %10, %11 : vector<8x128xi1>, vector<8x128xf32>
    %13 = arith.addf %0, %12 : vector<8x128xf32>
    %c1 = arith.constant 1 : index
    %c0_5 = arith.constant 0 : index
    %14 = vector.load %arg3[%c1, %c0_5] : memref<3x128xf32, #tpu.memory_space<vmem>>, vector<1x128xf32>
    %15 = vector.shape_cast %14 : vector<1x128xf32> to vector<128xf32>
    %c1_i32 = arith.constant 1 : i32
    %16 = vector.broadcast %c1_i32 : i32 to vector<8x1xi32>
    %17 = arith.cmpi eq, %1, %16 : vector<8x1xi32>
    %18 = vector.shape_cast %15 : vector<128xf32> to vector<1x128xf32>
    %cst_6 = arith.constant 0.000000e+00 : f32
    %19 = vector.shape_cast %17 : vector<8x1xi1> to vector<8x1xi1>
    %20 = vector.broadcast %19 : vector<8x1xi1> to vector<8x128xi1>
    %21 = vector.shape_cast %18 : vector<1x128xf32> to vector<1x128xf32>
    %22 = vector.broadcast %21 : vector<1x128xf32> to vector<8x128xf32>
    %23 = vector.broadcast %cst_6 : f32 to vector<8x128xf32>
    %24 = arith.select %20, %22, %23 : vector<8x128xi1>, vector<8x128xf32>
    %25 = arith.addf %13, %24 : vector<8x128xf32>
    %c2 = arith.constant 2 : index
    %c0_7 = arith.constant 0 : index
    %26 = vector.load %arg3[%c2, %c0_7] : memref<3x128xf32, #tpu.memory_space<vmem>>, vector<1x128xf32>
    %27 = vector.shape_cast %26 : vector<1x128xf32> to vector<128xf32>
    %c2_i32 = arith.constant 2 : i32
    %28 = vector.broadcast %c2_i32 : i32 to vector<8x1xi32>
    %29 = arith.cmpi eq, %1, %28 : vector<8x1xi32>
    %30 = vector.shape_cast %27 : vector<128xf32> to vector<1x128xf32>
    %cst_8 = arith.constant 0.000000e+00 : f32
    %31 = vector.shape_cast %29 : vector<8x1xi1> to vector<8x1xi1>
    %32 = vector.broadcast %31 : vector<8x1xi1> to vector<8x128xi1>
    %33 = vector.shape_cast %30 : vector<1x128xf32> to vector<1x128xf32>
    %34 = vector.broadcast %33 : vector<1x128xf32> to vector<8x128xf32>
    %35 = vector.broadcast %cst_8 : f32 to vector<8x128xf32>
    %36 = arith.select %32, %34, %35 : vector<8x128xi1>, vector<8x128xf32>
    %37 = arith.addf %25, %36 : vector<8x128xf32>
    %c0_9 = arith.constant 0 : index
    %c0_10 = arith.constant 0 : index
    %38 = vector.load %arg4[%c0_9, %c0_10] : memref<8x128xf32, #tpu.memory_space<vmem>>, vector<8x128xf32>
    tpu.vector_store %arg4[%c0_9, %c0_10], %37 {strides = array<i32>} : memref<8x128xf32, #tpu.memory_space<vmem>>, vector<8x128xf32>,
    return
  }
  func.func @transform_0(%arg0: i32) -> (i32, i32) {
    %c0_i32 = arith.constant 0 : i32
    %c0_i32_0 = arith.constant 0 : i32
    return %arg0, %c0_i32 : i32, i32
  }
  func.func @transform_1(%arg0: i32) -> (i32, i32) {
    %c0_i32 = arith.constant 0 : i32
    %c0_i32_0 = arith.constant 0 : i32
    return %arg0, %c0_i32 : i32, i32
  }
  func.func @transform_2(%arg0: i32) -> (i32, i32) {
    %c0_i32 = arith.constant 0 : i32
    %c0_i32_0 = arith.constant 0 : i32
    %c0_i32_1 = arith.constant 0 : i32
    return %c0_i32, %c0_i32_0 : i32, i32
  }
  func.func @transform_3(%arg0: i32) -> (i32, i32) {
    %c0_i32 = arith.constant 0 : i32
    %c0_i32_0 = arith.constant 0 : i32
    return %arg0, %c0_i32 : i32, i32
  }
}

</mosaic_0001>

<bundles_post_ra>
// kernel: tpu_custom_call.1
= control target key start
LH: loop header
LB: loop body
LE: loop exit
PB: predicated region body
PF: predicated region fallthrough
CT: control target
= control target key end

     0   :  { %s151_s0 = inlined_call_operand.vmem [shape: f32[8,128], index: 0, kind: input, shape index: {}]   ;;  %s152_s1 = inlined_call_operand.vmem [shape: s32[8,1], index: 1, kind: input, shape index: {}]   ;;  %s153_s2 = inlined_call_operand.vmem [shape: f32[3,128], index: 2, kind: input, shape index: {}]   ;;  %s154_s3 = inlined_call_operand.hbm [shape: f32[8,128], index: 3, kind: output, shape index: {}]  }
   0x1   :  { %v16_v0 = vld [vmem:[%s152_s1] sm:$0xff] }
   0x2   :  { %8 = vsyncpa [#allocation3], 0  ;;  %v102_v1 = vmov 0   ;;  %vm18_vm0 = vcmp.eq.s32.totalorder %v16_v0, 0  ;;  %vm31_vm1 = vcmp.eq.s32.totalorder %v16_v0, 1  ;;  %vm44_vm2 = vcmp.eq.s32.totalorder %v16_v0, 2 }
   0x3   :  { %76 = vset.pattern.permute.xlu0 %v102_v1  ;;  %77 = vset.pattern.permute.xlu1 %v102_v1  ;;  %v19_v2 = vsel %vm18_vm0, 1, %v102_v1  ;;  %v45_v3 = vsel %vm44_vm2, 1, %v102_v1  ;;  %v32_v4 = vsel %vm31_vm1, 1, %v102_v1  ;;  %v71_v5 = vld [vmem:[%s153_s2] ss:$0 sm:$0xff]  ;;  %s103_s21 = smov [#allocation2]  }
   0x4   :  { %21 = vperm.xlu0 %76, %v19_v2   ;;  %47 = vperm.xlu1 %77, %v45_v3   ;;  %v15_v8 = vld [vmem:[%s151_s0] sm:$0xff]  ;;  %s63_s22 = sshll.u32 %s103_s21, 4  ;;  %s64_s22 = int_to_ptr.vmem [resolvable:$true] %s63_s22 }
   0x5   :  { %v72_v10 = vld [vmem:[%s153_s2 + $0x1] ss:$0 sm:$0xff]  ;;  %v73_v11 = vld [vmem:[%s153_s2 + $0x2] ss:$0 sm:$0xff]  ;;  %s78_s0 = scalar_lea.vmem %s64_s22, 128  ;;  %p83_p1 = scmp.lt.s32.totalorder %s64_s22, %s64_s22 }
   0x6   :  { %p79_p0 = scmp.ne.s32.totalorder %s64_s22, %s78_s0  ;;  %p84_p2 = scmp.lt.s32.totalorder %s78_s0, %s78_s0 }
   0x8   :  { %34 = vperm.xlu0 %76, %v32_v4   ;;  %p85_p3 = por %p84_p2, %p83_p1 }
   0xa   :  { %p86_p4 = pnand %p85_p3, %p79_p0 }
  0x83   :  { %v22_v6 = vpop.permute.xlu0 %21  ;;  %v48_v7 = vpop.permute.xlu1 %47 }
  0x84   :  { %vm23_vm3 = vcmp.eq.s32.totalorder %v22_v6, 1  ;;  %vm49_vm4 = vcmp.eq.s32.totalorder %v48_v7, 1 }
  0x85   :  { %v28_v9 = vsel %vm23_vm3, %v71_v5, 0.0  ;;  %v54_v15 = vsel %vm49_vm4, %v73_v11, 0.0 }
  0x86   :  { %v29_v13 = vadd.f32 %v28_v9, %v15_v8 }
  0x87   :  { %v35_v12 = vpop.permute.xlu0 %34 }
  0x88   :  { %vm36_vm5 = vcmp.eq.s32.totalorder %v35_v12, 1 }
  0x89   :  { %v41_v14 = vsel %vm36_vm5, %v72_v10, 0.0 }
  0x8a   :  { %v42_v16 = vadd.f32 %v41_v14, %v29_v13 }
  0x8c   :  { %v55_v17 = vadd.f32 %v54_v15, %v42_v16 }
  0x8e   :  { %56 = vst [vmem:[#allocation2] sm:$0xff] %v55_v17 }
  0x8f   :  { %89 = shalt.err (!%p86_p4)
}
  0x90   :  { %s90_s24 = scalar_lea.hbm %s154_s3, 128 }
  0x91   :  { %p91_p5 = scmp.ne.s32.totalorder %s154_s3, %s90_s24  ;;  %p94_p6 = scmp.lt.u32.totalorder %s90_s24, %s154_s3 }
  0x93   :  { %p96_p7 = pnand %p94_p6, %p91_p5 }
  0x95   :  { %99 = shalt.err (!%p96_p7)
}
  0x96   :  { %66 = dma.vmem_to_hbm [thread:$0]  %s64_s22, 128, %s154_s3, [#allocation3]  }
  0x97   :  { %100 = dma.done.wait [#allocation3], 128  }
  0x98   :  { %101 = vsyncadd [#allocation3], 4294967168 }
  0x99   :  { %70 = vsyncpa [#allocation3], 1 }

</bundles_post_ra>
